<compile_context>
chip_gen: v7x
topology: tpu7x:2x2x1
jax: 0.10.0
libtpu: 0.0.40
codegen_flags: <defaults>
</compile_context>

<pallas_src>
import functools

import jax
import jax.numpy as jnp
from jax.experimental import pallas as pl
from jax.experimental.pallas import tpu as pltpu

_VMEM_LIMIT = 32 * 1024 * 1024  # working sets stay far below this on v5e/v6e/v7x


# ---------------------- Pallas kernel: fused 3x3 conv (+bias, +act) ----------
def _conv3x3_kernel(x_ref, w_ref, b_ref, m_ref, o_ref, pad_ref, *,
                    H, W, negative_slope, apply_tanh):
    # x_ref  : (1, Cin, H*W)          bf16  channel-major, flat spatial on lanes
    # w_ref  : (Cout, 9*Cin)          bf16  column index = (kh*3+kw)*Cin + c
    # b_ref  : (Cout, 1)              f32
    # m_ref  : (2, H*W)               bf16  [0]=left-neighbour-valid, [1]=right-valid
    # o_ref  : (1, Cout, H*W)         bf16  lane-dense output
    # pad_ref: (Cin, H*W + 2*(W+1))   bf16  scratch with a zero halo of W+1 each side
    cin = x_ref.shape[1]
    L = H * W
    halo = W + 1

    # fused zero padding (replaces an XLA pad pass over HBM)
    pad_ref[:, 0:halo] = jnp.zeros((cin, halo), pad_ref.dtype)
    pad_ref[:, halo + L:halo + L + halo] = jnp.zeros((cin, halo), pad_ref.dtype)
    pad_ref[:, halo:halo + L] = x_ref[0]

    left = m_ref[0:1, :]     # 0 where w == 0     (kills wrap-around from previous row)
    right = m_ref[1:2, :]    # 0 where w == W - 1 (kills wrap-around from next row)

    # in-VMEM im2col: 9 shifted lane-slices folded into the matmul K dimension.
    taps = []
    for dh in (-1, 0, 1):
        for dw in (-1, 0, 1):
            start = halo + dh * W + dw
            xt = pad_ref[:, start:start + L]              # (Cin, H*W) shifted window
            if dw == -1:
                xt = xt * left
            elif dw == 1:
                xt = xt * right
            taps.append(xt)
    patches = jnp.concatenate(taps, axis=0)               # (9*Cin, H*W) bf16

    acc = jnp.dot(w_ref[...], patches,
                  preferred_element_type=jnp.float32)     # (Cout, H*W) f32, one MXU pass
    acc = acc + b_ref[...]                                 # f32 epilogue
    if negative_slope is not None:
        acc = jnp.where(acc >= 0.0, acc, negative_slope * acc)
    if apply_tanh:
        acc = jnp.tanh(acc)
    o_ref[0] = acc.astype(o_ref.dtype)


def _column_masks(H, W):
    w_idx = jnp.arange(H * W, dtype=jnp.int32) % W
    left = (w_idx != 0).astype(jnp.bfloat16)
    right = (w_idx != W - 1).astype(jnp.bfloat16)
    return jnp.stack([left, right], axis=0)                # (2, H*W)


def conv3x3(x_flat, w2, bias, H, W, negative_slope=None, apply_tanh=False):
    """3x3 'same' conv (stride 1, zero padding), channel-major and lane-dense.

    x_flat: (B, Cin, H*W) any float -> (B, Cout, H*W) bf16.
    w2    : (Cout, 9*Cin) bf16 (tap-major columns);  bias: (Cout, 1) f32.
    """
    B, Cin, L = x_flat.shape
    assert L == H * W
    Cout = w2.shape[0]
    x = x_flat.astype(jnp.bfloat16)
    masks = _column_masks(H, W)
    return pl.pallas_call(
        functools.partial(_conv3x3_kernel, H=H, W=W,
                          negative_slope=negative_slope, apply_tanh=apply_tanh),
        out_shape=jax.ShapeDtypeStruct((B, Cout, L), jnp.bfloat16),
        grid=(B,),
        in_specs=[
            pl.BlockSpec((1, Cin, L), lambda b: (b, 0, 0)),
            pl.BlockSpec((Cout, 9 * Cin), lambda b: (0, 0)),   # resident across batch
            pl.BlockSpec((Cout, 1), lambda b: (0, 0)),
            pl.BlockSpec((2, L), lambda b: (0, 0)),
        ],
        out_specs=pl.BlockSpec((1, Cout, L), lambda b: (b, 0, 0)),
        scratch_shapes=[pltpu.VMEM((Cin, L + 2 * (W + 1)), jnp.bfloat16)],
        compiler_params=pltpu.CompilerParams(
            dimension_semantics=("parallel",),
            vmem_limit_bytes=_VMEM_LIMIT),
    )(x, w2, bias, masks)


# ---------------------- Pallas kernel: separable bilinear grid_sample --------
def _grid_sample_kernel(img_ref, wx_ref, wy_ref, out_ref, *, H, C):
    # img_ref: (1, C*H, W) bf16 (tanh'd image; resident across the P axis per b)
    # wx_ref : (W, Pt) bf16  hat weights along x;  wy_ref: (H, Pt) bf16 along y
    # out_ref: (1, C, Pt) f32
    t = jnp.dot(img_ref[0], wx_ref[...],
                preferred_element_type=jnp.float32)        # (C*H, Pt) f32, MXU
    t = t.reshape(C, H, -1) * wy_ref[...][None]            # weight by y hat (VPU)
    out_ref[0] = jnp.sum(t, axis=1)                        # reduce H (XLU) -> (C, Pt)


def _round_up(x, m):
    return ((x + m - 1) // m) * m


def _hat_weights(coords, n):
    # bilinear hat weights == grid_sample(mode='bilinear', padding_mode='zeros',
    # align_corners=True):  weight(i) = max(0, 1 - |i - c|)
    c = (coords.astype(jnp.float32) + 1.0) * 0.5 * (n - 1.0)   # (P,)
    idx = jnp.arange(n, dtype=jnp.float32)[:, None]            # (n, 1)
    return jnp.maximum(0.0, 1.0 - jnp.abs(idx - c[None, :]))   # (n, P)


def grid_sample_separable(img2, gx, gy, *, H, W, C):
    """F.grid_sample(mode='bilinear', align_corners=True, padding_mode='zeros').

    img2: (B, C*H, W) bf16;  gx, gy: (P,) shared across batch  ->  (B, C, P) f32.
    """
    B = img2.shape[0]
    P = gx.shape[0]
    Pt = min(1024, _round_up(P, 128))        # lane-dense tiles, amortizes per-step cost
    Pp = _round_up(P, Pt)
    wx = jnp.pad(_hat_weights(gx, W), ((0, 0), (0, Pp - P))).astype(jnp.bfloat16)
    wy = jnp.pad(_hat_weights(gy, H), ((0, 0), (0, Pp - P))).astype(jnp.bfloat16)
    out = pl.pallas_call(
        functools.partial(_grid_sample_kernel, H=H, C=C),
        out_shape=jax.ShapeDtypeStruct((B, C, Pp), jnp.float32),
        grid=(B, Pp // Pt),
        in_specs=[
            pl.BlockSpec((1, C * H, W), lambda b, p: (b, 0, 0)),   # resident over p
            pl.BlockSpec((W, Pt), lambda b, p: (0, p)),
            pl.BlockSpec((H, Pt), lambda b, p: (0, p)),
        ],
        out_specs=pl.BlockSpec((1, C, Pt), lambda b, p: (b, 0, p)),
        compiler_params=pltpu.CompilerParams(
            dimension_semantics=("parallel", "parallel"),
            vmem_limit_bytes=_VMEM_LIMIT),
    )(img2, wx, wy)
    return out[:, :, :P]


# ---------------------- decoder + full forward -------------------------------
def convert_conv_weight(w_oihw):
    """PyTorch (Cout, Cin, 3, 3) conv weight -> (Cout, 9*Cin) bf16, tap-major."""
    cout, cin = w_oihw.shape[0], w_oihw.shape[1]
    return jnp.transpose(w_oihw, (0, 2, 3, 1)).reshape(cout, 9 * cin).astype(jnp.bfloat16)


def init_params(key, nc_init, n_upconv, nc_final=3, scale=0.05):
    """Synthetic conv params: [(Cout, 9*Cin) bf16, (Cout, 1) f32] per layer."""
    params = []
    c_in = nc_init
    for _ in range(n_upconv):
        c_out = max(c_in // 2, 8)
        key, kw, kb = jax.random.split(key, 3)
        w = jax.random.normal(kw, (c_out, c_in, 3, 3), jnp.float32) * scale
        b = jax.random.normal(kb, (c_out,), jnp.float32) * scale
        params.append((convert_conv_weight(w), b.reshape(c_out, 1)))
        c_in = c_out
    key, kw, kb = jax.random.split(key, 3)
    w = jax.random.normal(kw, (nc_final, c_in, 3, 3), jnp.float32) * scale
    b = jax.random.normal(kb, (nc_final,), jnp.float32) * scale
    params.append((convert_conv_weight(w), b.reshape(nc_final, 1)))
    return params


def decoder2d_upsample(feat_nchw, params):
    # TODO(synk): exact decoder2d definition is not in the reference snippet; this is
    # the 'upsample' path: n_upconv x [bilinear x2 -> 3x3 conv -> leaky_relu(0.2)]
    # followed by a final 3x3 conv to 3 channels (tanh fused into that conv's epilogue).
    x = feat_nchw.astype(jnp.bfloat16)                      # stays NCHW throughout
    B = x.shape[0]
    for (w2, b) in params[:-1]:
        _, C, H, W = x.shape
        x = jax.image.resize(x, (B, C, 2 * H, 2 * W), method="bilinear")
        H, W = 2 * H, 2 * W
        y = conv3x3(x.reshape(B, C, H * W), w2, b, H, W, negative_slope=0.2)
        x = y.reshape(B, w2.shape[0], H, W)                 # free XLA reshape
    w2, b = params[-1]
    _, C, H, W = x.shape
    y = conv3x3(x.reshape(B, C, H * W), w2, b, H, W,
                negative_slope=None, apply_tanh=True)        # tanh fused here
    return y.reshape(B, w2.shape[0], H, W)                   # (B, 3, H, W) bf16


def texture_predictor_forward(feat_nchw, uv_sampler, params, T, F):
    """Matches TexturePredictor.forward (decoder_name != 'SPADE', so tanh is applied)."""
    uvimage = decoder2d_upsample(feat_nchw, params)          # (B, 3, H, W) bf16, tanh'd
    B, C, H, W = uvimage.shape
    img2 = uvimage.reshape(B, C * H, W)                      # free reshape, lane dim = W
    # uv_sampler (F, T, T, 2): identical for every batch element, so the reference's
    # per-batch repeat is redundant; pass the coords once.
    P = F * T * T
    uv = uv_sampler.reshape(P, 2)
    tex = grid_sample_separable(img2, uv[:, 0], uv[:, 1], H=H, W=W, C=C)   # (B, 3, P)
    # the reference's view/permute/expand/slice collapses to this transpose+reshape:
    tex = jnp.transpose(tex, (0, 2, 1)).reshape(B, F, T * T, C)
    return tex


if __name__ == "__main__":
    key = jax.random.PRNGKey(0)
    # Small synthetic shapes consistent with the module's forward
    B, nc_init, h0, w0 = 2, 32, 4, 4
    n_upconv = 2            # decoder output: (B, 3, 16, 16)
    T, F = 2, 16            # uv_sampler (F, T, T, 2); P = F*T*T = 64

    key, kf, ku, kp = jax.random.split(key, 4)
    feat = jax.random.normal(kf, (B, nc_init, h0, w0), jnp.float32)   # NCHW like PyTorch
    uv_sampler = jax.random.uniform(ku, (F, T, T, 2), jnp.float32,
                                    minval=-1.0, maxval=1.0)
    params = init_params(kp, nc_init, n_upconv)

    out = texture_predictor_forward(feat, uv_sampler, params, T=T, F=F)
    out = jax.block_until_ready(out)
    assert out.shape == (B, F, T * T, 3), out.shape
    print("KERNEL_OK")
</pallas_src>

<mosaic_0001>
module attributes {stable_mosaic.version = 11 : i64} {
  func.func @_conv3x3_kernel(%arg0: i32, %arg1: memref<1x32x64xbf16, #tpu.memory_space<vmem>>, %arg2: memref<16x288xbf16, #tpu.memory_space<vmem>>, %arg3: memref<16x1xf32, #tpu.memory_space<vmem>>, %arg4: memref<2x64xbf16, #tpu.memory_space<vmem>>, %arg5: memref<1x16x64xbf16, #tpu.memory_space<vmem>>, %arg6: memref<32x82xbf16, #tpu.memory_space<vmem>>) attributes {dimension_semantics = [#tpu.dimension_semantics<parallel>], iteration_bounds = array<i64: 2>, scalar_prefetch = 0 : i64, scratch_operands = 1 : i64, tpu.core_type = #tpu.core_type<tc>, window_params = [{transform_indices = @transform_0, window_bounds = array<i64: 1, 32, 64>}, {pipeline_mode = #tpu.pipeline_mode<synchronous>, transform_indices = @transform_1, window_bounds = array<i64: 16, 288>}, {pipeline_mode = #tpu.pipeline_mode<synchronous>, transform_indices = @transform_2, window_bounds = array<i64: 16, 1>}, {pipeline_mode = #tpu.pipeline_mode<synchronous>, transform_indices = @transform_3, window_bounds = array<i64: 2, 64>}, {transform_indices = @transform_4, window_bounds = array<i64: 1, 16, 64>}]} {
    %cst = arith.constant 0.000000e+00 : bf16
    %0 = vector.broadcast %cst : bf16 to vector<32x9xbf16>
    %c0 = arith.constant 0 : index
    %c0_0 = arith.constant 0 : index
    %1 = vector.load %arg6[%c0, %c0_0] : memref<32x82xbf16, #tpu.memory_space<vmem>>, vector<32x9xbf16>
    tpu.vector_store %arg6[%c0, %c0_0], %0 {strides = array<i32>} : memref<32x82xbf16, #tpu.memory_space<vmem>>, vector<32x9xbf16>,
    %cst_1 = arith.constant 0.000000e+00 : bf16
    %2 = vector.broadcast %cst_1 : bf16 to vector<32x9xbf16>
    %c0_2 = arith.constant 0 : index
    %c73 = arith.constant 73 : index
    %3 = vector.load %arg6[%c0_2, %c73] : memref<32x82xbf16, #tpu.memory_space<vmem>>, vector<32x9xbf16>
    tpu.vector_store %arg6[%c0_2, %c73], %2 {strides = array<i32>} : memref<32x82xbf16, #tpu.memory_space<vmem>>, vector<32x9xbf16>,
    %c0_3 = arith.constant 0 : index
    %c0_4 = arith.constant 0 : index
    %c0_5 = arith.constant 0 : index
    %4 = vector.load %arg1[%c0_3, %c0_4, %c0_5] : memref<1x32x64xbf16, #tpu.memory_space<vmem>>, vector<1x32x64xbf16>
    %5 = vector.shape_cast %4 : vector<1x32x64xbf16> to vector<32x64xbf16>
    %c0_6 = arith.constant 0 : index
    %c9 = arith.constant 9 : index
    %6 = vector.load %arg6[%c0_6, %c9] : memref<32x82xbf16, #tpu.memory_space<vmem>>, vector<32x64xbf16>
    tpu.vector_store %arg6[%c0_6, %c9], %5 {strides = array<i32>} : memref<32x82xbf16, #tpu.memory_space<vmem>>, vector<32x64xbf16>,
    %c0_7 = arith.constant 0 : index
    %c0_8 = arith.constant 0 : index
    %7 = vector.load %arg4[%c0_7, %c0_8] : memref<2x64xbf16, #tpu.memory_space<vmem>>, vector<1x64xbf16>
    %c1 = arith.constant 1 : index
    %c0_9 = arith.constant 0 : index
    %8 = vector.load %arg4[%c1, %c0_9] : memref<2x64xbf16, #tpu.memory_space<vmem>>, vector<1x64xbf16>
    %c0_10 = arith.constant 0 : index
    %c0_11 = arith.constant 0 : index
    %9 = vector.load %arg6[%c0_10, %c0_11] : memref<32x82xbf16, #tpu.memory_space<vmem>>, vector<32x64xbf16>
    %10 = vector.broadcast %7 : vector<1x64xbf16> to vector<32x64xbf16>
    %11 = arith.mulf %9, %10 : vector<32x64xbf16>
    %c0_12 = arith.constant 0 : index
    %c1_13 = arith.constant 1 : index
    %12 = vector.load %arg6[%c0_12, %c1_13] : memref<32x82xbf16, #tpu.memory_space<vmem>>, vector<32x64xbf16>
    %c0_14 = arith.constant 0 : index
    %c2 = arith.constant 2 : index
    %13 = vector.load %arg6[%c0_14, %c2] : memref<32x82xbf16, #tpu.memory_space<vmem>>, vector<32x64xbf16>
    %14 = vector.broadcast %8 : vector<1x64xbf16> to vector<32x64xbf16>
    %15 = arith.mulf %13, %14 : vector<32x64xbf16>
    %c0_15 = arith.constant 0 : index
    %c8 = arith.constant 8 : index
    %16 = vector.load %arg6[%c0_15, %c8] : memref<32x82xbf16, #tpu.memory_space<vmem>>, vector<32x64xbf16>
    %17 = vector.broadcast %7 : vector<1x64xbf16> to vector<32x64xbf16>
    %18 = arith.mulf %16, %17 : vector<32x64xbf16>
    %c0_16 = arith.constant 0 : index
    %c9_17 = arith.constant 9 : index
    %19 = vector.load %arg6[%c0_16, %c9_17] : memref<32x82xbf16, #tpu.memory_space<vmem>>, vector<32x64xbf16>
    %c0_18 = arith.constant 0 : index
    %c10 = arith.constant 10 : index
    %20 = vector.load %arg6[%c0_18, %c10] : memref<32x82xbf16, #tpu.memory_space<vmem>>, vector<32x64xbf16>
    %21 = vector.broadcast %8 : vector<1x64xbf16> to vector<32x64xbf16>
    %22 = arith.mulf %20, %21 : vector<32x64xbf16>
    %c0_19 = arith.constant 0 : index
    %c16 = arith.constant 16 : index
    %23 = vector.load %arg6[%c0_19, %c16] : memref<32x82xbf16, #tpu.memory_space<vmem>>, vector<32x64xbf16>
    %24 = vector.broadcast %7 : vector<1x64xbf16> to vector<32x64xbf16>
    %25 = arith.mulf %23, %24 : vector<32x64xbf16>
    %c0_20 = arith.constant 0 : index
    %c17 = arith.constant 17 : index
    %26 = vector.load %arg6[%c0_20, %c17] : memref<32x82xbf16, #tpu.memory_space<vmem>>, vector<32x64xbf16>
    %c0_21 = arith.constant 0 : index
    %c18 = arith.constant 18 : index
    %27 = vector.load %arg6[%c0_21, %c18] : memref<32x82xbf16, #tpu.memory_space<vmem>>, vector<32x64xbf16>
    %28 = vector.broadcast %8 : vector<1x64xbf16> to vector<32x64xbf16>
    %29 = arith.mulf %27, %28 : vector<32x64xbf16>
    %30 = tpu.concatenate %11, %12, %15, %18, %19, %22, %25, %26, %29 in 0 : vector<32x64xbf16>, vector<32x64xbf16>, vector<32x64xbf16>, vector<32x64xbf16>, vector<32x64xbf16>, vector<32x64xbf16>, vector<32x64xbf16>, vector<32x64xbf16>, vector<32x64xbf16> -> vector<288x64xbf16>
    %c0_22 = arith.constant 0 : index
    %c0_23 = arith.constant 0 : index
    %31 = vector.load %arg2[%c0_22, %c0_23] : memref<16x288xbf16, #tpu.memory_space<vmem>>, vector<16x288xbf16>
    %cst_24 = arith.constant dense<0.000000e+00> : vector<16x64xf32>
    %32 = tpu.matmul %31, %30, %cst_24 {dimension_numbers = #tpu.dot_dimension_numbers<[1], [0], [0], [1], [0, 0, 1, 1], [], []>} : vector<16x288xbf16>, vector<288x64xbf16>, vector<16x64xf32> -> vector<16x64xf32>
    %c0_25 = arith.constant 0 : index
    %c0_26 = arith.constant 0 : index
    %33 = vector.load %arg3[%c0_25, %c0_26] : memref<16x1xf32, #tpu.memory_space<vmem>>, vector<16x1xf32>
    %34 = vector.broadcast %33 : vector<16x1xf32> to vector<16x64xf32>
    %35 = arith.addf %32, %34 : vector<16x64xf32>
    %cst_27 = arith.constant 0.000000e+00 : f32
    %36 = vector.broadcast %cst_27 : f32 to vector<16x64xf32>
    %37 = arith.cmpf oge, %35, %36 : vector<16x64xf32>
    %cst_28 = arith.constant 2.000000e-01 : f32
    %38 = vector.broadcast %cst_28 : f32 to vector<16x64xf32>
    %39 = arith.mulf %38, %35 : vector<16x64xf32>
    %40 = arith.select %37, %35, %39 : vector<16x64xi1>, vector<16x64xf32>
    %41 = arith.truncf %40 : vector<16x64xf32> to vector<16x64xbf16>
    %c0_29 = arith.constant 0 : index
    %c0_30 = arith.constant 0 : index
    %c0_31 = arith.constant 0 : index
    %42 = vector.load %arg5[%c0_29, %c0_30, %c0_31] : memref<1x16x64xbf16, #tpu.memory_space<vmem>>, vector<1x16x64xbf16>
    %43 = vector.shape_cast %42 : vector<1x16x64xbf16> to vector<16x64xbf16>
    %44 = vector.shape_cast %41 : vector<16x64xbf16> to vector<1x16x64xbf16>
    tpu.vector_store %arg5[%c0_29, %c0_30, %c0_31], %44 {strides = array<i32>} : memref<1x16x64xbf16, #tpu.memory_space<vmem>>, vector<1x16x64xbf16>,
    return
  }
  func.func @transform_0(%arg0: i32) -> (i32, i32, i32) {
    %c0_i32 = arith.constant 0 : i32
    %c0_i32_0 = arith.constant 0 : i32
    %c0_i32_1 = arith.constant 0 : i32
    return %arg0, %c0_i32, %c0_i32_0 : i32, i32, i32
  }
  func.func @transform_1(%arg0: i32) -> (i32, i32) {
    %c0_i32 = arith.constant 0 : i32
    %c0_i32_0 = arith.constant 0 : i32
    %c0_i32_1 = arith.constant 0 : i32
    return %c0_i32, %c0_i32_0 : i32, i32
  }
  func.func @transform_2(%arg0: i32) -> (i32, i32) {
    %c0_i32 = arith.constant 0 : i32
    %c0_i32_0 = arith.constant 0 : i32
    %c0_i32_1 = arith.constant 0 : i32
    return %c0_i32, %c0_i32_0 : i32, i32
  }
  func.func @transform_3(%arg0: i32) -> (i32, i32) {
    %c0_i32 = arith.constant 0 : i32
    %c0_i32_0 = arith.constant 0 : i32
    %c0_i32_1 = arith.constant 0 : i32
    return %c0_i32, %c0_i32_0 : i32, i32
  }
  func.func @transform_4(%arg0: i32) -> (i32, i32, i32) {
    %c0_i32 = arith.constant 0 : i32
    %c0_i32_0 = arith.constant 0 : i32
    %c0_i32_1 = arith.constant 0 : i32
    return %arg0, %c0_i32, %c0_i32_0 : i32, i32, i32
  }
}

</mosaic_0001>

<bundles_post_ra>
// kernel: tpu_custom_call.1
= control target key start
LH: loop header
LB: loop body
LE: loop exit
PB: predicated region body
PF: predicated region fallthrough
CT: control target
= control target key end

     0   :  { %9 = vsyncpa [#allocation4], 0  ;;  %s1148_s0 = inlined_call_operand.hbm [shape: bf16[2,32,64], index: 0, kind: input, shape index: {}]   ;;  %s1149_s1 = inlined_call_operand.hbm [shape: bf16[16,288], index: 1, kind: input, shape index: {}]   ;;  %s1150_s2 = inlined_call_operand.vmem [shape: f32[16,1], index: 2, kind: input, shape index: {}]   ;;  %s1151_s3 = inlined_call_operand.vmem [shape: bf16[2,64], index: 3, kind: input, shape index: {}]   ;;  %s1152_s4 = inlined_call_operand.hbm [shape: bf16[2,16,64], index: 4, kind: output, shape index: {}]  }
   0x1   :  { %11 = vsyncpa [#allocation4 + $0x1], 0 }
   0x2   :  { %12 = vsyncpa [#allocation7], 0 }
   0x3   :  { %13 = vsyncpa [#allocation5], 0 }
   0x4   :  { %15 = vsyncpa [#allocation5 + $0x1], 0  ;;  %s928_s15 = smov 0   ;;  %s930_s16 = smov 0  }
   0x5   :  { %s932_s17 = smov 0   ;;  %s934_s18 = smov 0  }
   0x6 LB: > { %s949_s19 = sadd.s32 4294967295, %s875_s18   ;;  %s598_s20 = sadd.s32 4294967294, %s875_s18   ;;  %s875_s18 = sphi %s934_s18, %s1172_s18   ;;  %s871_s17 = sphi %s932_s17, %s1171_s17   ;;  %s867_s16 = sphi %s930_s16, %s1170_s16   ;;  %s863_s15 = sphi %s928_s15, %s1169_s15  }
   0x7   : > { %p41_p0 = scmp.ne.s32.totalorder %s867_s16, %s863_s15  ;;  %p1153_p1 = scmp.eq.s32.totalorder %s949_s19, 0 }
   0x8   : > { %p134_p3 = scmp.eq.s32.totalorder %s598_s20, 1  ;;  %p599_p5 = scmp.ge.s32.totalorder %s875_s18, 1 }
   0x9   : > { %p958_p4 = por %p1153_p1, %p41_p0  ;;  %p141_p7 = scmp.lt.s32.totalorder %s875_s18, 3 }
   0xa   : > { %p963_p6 = por %p134_p3, %p41_p0  ;;  %s877_s24 = smov [#allocation6]  }
   0xb   : > { %s1156_s21 = scalar_select %p958_p4, 1, 0 }
   0xc   : > { %s1157_s22 = scalar_select %p963_p6, 1, 0 }
   0xd   : > { %p968_p8 = pnand %p599_p5, %p141_p7  ;;  %s153_s25 = sshll.u32 %s877_s24, 4  ;;  %s972_s25 = int_to_ptr.vmem [resolvable:$true] %s153_s25 }
   0xe   : > { %s984_s27 = sadd.s32 1, %s875_s18   ;;  %s28_s28 = sadd.s32 1, %s871_s17 }
   0xf   : > { %s1158_s23 = scalar_select %p968_p8, 1, 0 }
  0x10   : > { %p667_p9 = pneg %p968_p8  ;;  %s25_s29 = ssub.s32 %s875_s18, %s984_s27 }
  0x11   : > { %s747_s6 = scalar_lea.hbm %s1149_s1, 384 }
  0x12   : > { %p979_p11 = pnand %p667_p9, %p1153_p1  ;;  %p748_p12 = scmp.ne.s32.totalorder %s1149_s1, %s747_s6 }
  0x13   : > { %p754_p5 = scmp.lt.u32.totalorder %s747_s6, %s1149_s1 }
  0x14   : > { %p749_p13 = pneg %p979_p11 }
  0x16   : > { %p750_p0 = pnand %p749_p13, %p748_p12 }
  0x18   : > { %p751_p3 = pneg %p750_p0 }
  0x1a   : > { %p756_p7 = pnand %p754_p5, %p751_p3 }
  0x1c   : > { %759 = shalt.err (!%p756_p7)
}
  0x1d   : > { %s760_s11 = scalar_lea.vmem %s972_s25, 384  ;;  %p768_p2 = scmp.lt.s32.totalorder %s972_s25, %s972_s25 }
  0x1e   : > { %p761_p9 = scmp.ne.s32.totalorder %s972_s25, %s760_s11  ;;  %p769_p6 = scmp.lt.s32.totalorder %s760_s11, %s760_s11 }
  0x20   : > { %p763_p10 = pnand %p761_p9, %p749_p13  ;;  %p770_p4 = por %p769_p6, %p768_p2 }
  0x22   : > { %p764_p1 = pneg %p763_p10 }
  0x24   : > { %p771_p8 = pnand %p770_p4, %p764_p1 }
  0x26   : > { %774 = shalt.err (!%p771_p8)
}
  0x27   : > { %s878_s12 = smov 192   ;;  %s879_s13 = smov 12  }
  0x28   : > { %670 = dma.hbm_to_vmem [thread:$0]  (!%p979_p11), %s1149_s1, 384, %s972_s25, [#allocation7], %s878_s12, %s878_s12, %s879_s13  }
  0x29   : > { %p26_p2 = scmp.eq.s32.totalorder %s25_s29, 0  ;;  %p35_p1 = scmp.ne.s32.totalorder %s871_s17, %s867_s16 }
  0x2a   : > { %p36_p4 = scmp.eq.s32.totalorder %s875_s18, 0  ;;  %p680_p6 = scmp.lt.s32.totalorder %s875_s18, 2 }
  0x2b   : > { %s1015_s24 = scalar_select %p26_p2, %s871_s17, %s28_s28  }
  0x2c   : > { %p37_p8 = por %p36_p4, %p35_p1  ;;  %p1160_p10 = scmp.eq.s32.totalorder %s949_s19, 1 }
  0x2d   : > { %s173_s5 = sand.u32 1, %s871_s17   ;;  %s622_s6 = sshll.u32 %s875_s18, 8 }
  0x2e   : > { %p1019_p12 = por %p1160_p10, %p35_p1  ;;  %s602_s7 = sshll.u32 %s173_s5, 4 }
  0x2f   : > { %s1028_s9 = scalar_lea.hbm %s1148_s0, %s622_s6  ;;  %s177_s25 = scalar_lea.vmem [#allocation3], %s602_s7 }
  0x30   : > { %s184_s28 = sshll.u32 %s177_s25, 4  ;;  %p1030_p11 = pnand %p680_p6, %p37_p8  ;;  %s1034_s28 = int_to_ptr.vmem [resolvable:$true] %s184_s28 }
  0x31   : > { %s1036_s10 = scalar_lea.sflag [#allocation4], %s173_s5  ;;  %s775_s11 = scalar_lea.hbm %s1028_s9, 256 }
  0x32   : > { %p776_p13 = scmp.ne.s32.totalorder %s1028_s9, %s775_s11  ;;  %p777_p0 = pneg %p1030_p11 }
  0x33   : > { %s780_s14 = scalar_lea.hbm %s1148_s0, 512  ;;  %p781_p7 = scmp.lt.u32.totalorder %s1028_s9, %s1148_s0 }
  0x34   : > { %p778_p3 = pnand %p777_p0, %p776_p13  ;;  %p782_p9 = scmp.lt.u32.totalorder %s780_s14, %s775_s11 }
  0x35   : > { %p784_p1 = scmp.lt.u32.totalorder %s775_s11, %s1028_s9 }
  0x36   : > { %p779_p5 = pneg %p778_p3  ;;  %p783_p2 = por %p782_p9, %p781_p7 }
  0x38   : > { %p785_p4 = por %p784_p1, %p783_p2 }
  0x3a   : > { %p786_p6 = pnand %p785_p4, %p779_p5 }
  0x3c   : > { %789 = shalt.err (!%p786_p6)
}
  0x3d   : > { %s790_s5 = scalar_lea.vmem %s1034_s28, 256  ;;  %s880_s7 = smov [#allocation3]  }
  0x3e   : > { %p791_p8 = scmp.ne.s32.totalorder %s1034_s28, %s790_s5  ;;  %s795_s26 = sshll.u32 %s880_s7, 4  ;;  %s796_s26 = int_to_ptr.vmem [resolvable:$false] %s795_s26 }
  0x3f   : > { %s797_s8 = scalar_lea.vmem %s796_s26, 512  ;;  %p798_p3 = scmp.lt.s32.totalorder %s1034_s28, %s796_s26 }
  0x40   : > { %p793_p10 = pnand %p791_p8, %p777_p0  ;;  %p799_p7 = scmp.lt.s32.totalorder %s797_s8, %s790_s5 }
  0x42   : > { %p794_p13 = pneg %p793_p10  ;;  %p800_p9 = por %p799_p7, %p798_p3 }
  0x44   : > { %p801_p2 = pnand %p800_p9, %p794_p13 }
  0x46   : > { %804 = shalt.err (!%p801_p2)
}
  0x47   : > { %s881_s25 = smov 64   ;;  %s882_s11 = smov 4  }
  0x48   : > { %674 = dma.hbm_to_vmem [thread:$0]  (!%p1030_p11), %s1028_s9, 256, %s1034_s28, %s1036_s10, %s881_s25, %s881_s25, %s882_s11  }
  0x49   : > { %p1163_p0 = scmp.ne.s32.totalorder %s1158_s23, 0 }
  0x4a   : > { %s1067_s12 = sand.u32 (!%p1163_p0), 1, %s867_s16   ;;  %p1164_p5 = scmp.ne.s32.totalorder (!%p1163_p0), %s1156_s21, 0 }
  0x4b   : > { %196 = sbr.rel (%p1163_p0) target bundleno = 599 (0x257), region = 36  ;;  %s606_s13 = sshll.u32 (!%p1163_p0), %s1067_s12, 4 }
  0x4c   : > { %s199_s14 = scalar_lea.sflag (!%p1163_p0), [#allocation4], %s1067_s12  ;;  %s202_s20 = scalar_lea.vmem (!%p1163_p0), [#allocation3], %s606_s13 }
  0x52   : > { %850 = dma.done.wait (%p1164_p5), %s199_s14, 256  }
  0x53   : > { %852 = vsyncadd (%p1164_p5), %s199_s14, 4294967040  ;;  %p1165_p1 = scmp.eq.s32.totalorder %s949_s19, 0 }
  0x55   : > { %854 = dma.done.wait (%p1165_p1), [#allocation7], 384   ;;  %p1166_p11 = pmov %p1165_p1 }
  0x56   : > { %vm232_vm0 = vcmask 72704   ;;  %v267_v0 = vlaneseq  ;;  %vm235_vm1 = vcmask 671304   ;;  %v883_v1 = vmov 0   ;;  %v741_v3 = vld [vmem:[%s202_s20] sm:$0xff]   ;;  %s884_s9 = smov 9   ;;  %v742_v7 = vld [vmem:[%s202_s20 + $0x8] sm:$0xff]  }
  0x57   : > { %856 = vsyncadd (%p1166_p11), [#allocation7], 4294966912  ;;  %233 = vst.msk [vmem:[#allocation2] sm:$0xff] %vm232_vm0, %v883_v1  ;;  %739 = vset.pattern.permute.xlu1 %v883_v1  ;;  %740 = vset.pattern.permute.xlu0 %v883_v1  ;;  %v261_v4 = vld [vmem:[%s1151_s3] sm:$0x1]  ;;  %s885_s28 = smov 10  }
  0x58   : > { %234 = vst.msk [vmem:[#allocation2 + $0x8] sm:$0xff] %vm232_vm0, %v883_v1  ;;  %v268_v2 = vshrl.u32 %v267_v0, 7  ;;  %252 = vrot.lane.b32.xlu0 %v741_v3, %s884_s9  ;;  %v273_v6 = vshrl.u32 %v261_v4, 16  ;;  %v265_v9 = vpack.i.b16 %v261_v4, %v261_v4  ;;  %s886_s29 = smov 2   ;;  %s887_s10 = smov 16   ;;  %vm258_vm2 = vcmask 597064  }
  0x59   : > { %236 = vst.msk [vmem:[#allocation2] sm:$0xff] %vm235_vm1, %v883_v1  ;;  %237 = vst.msk [vmem:[#allocation2 + $0x8] sm:$0xff] %vm235_vm1, %v883_v1  ;;  %s888_s6 = smov 18   ;;  %s889_s5 = smov 8   ;;  %v894_v23 = vmov 0.0   ;;  %vm897_vm3 = vmmov 0  }
  0x5a   : > { %v269_v5 = vsub.s32 0, %v268_v2  ;;  %v274_v8 = vpack.i.b16 %v273_v6, %v273_v6  ;;  %s890_s7 = smov 119   ;;  %s891_s26 = smov 118   ;;  %651 = vmatprep.subr.bf16.mxu1 %v894_v23  ;;  %v745_v25 = vld [vmem:[#allocation6 + $0x4] ss:$12 sps:$4 sm:$0xff]   ;;  %655 = vmatprep.mubr.msk.bf16.mxu1 %vm897_vm3, %v894_v23  ;;  %v372_v34 = vld [vmem:[%s1150_s2 + $0x8] sm:$0xff] }
  0x5b   : > { %s892_s8 = smov 127   ;;  %s893_s25 = smov 112   ;;  %434 = vmatprep.mubr.bf16.mxu0 %v745_v25  ;;  %v371_v33 = vld [vmem:[%s1150_s2] sm:$0xff]  ;;  %v743_v52 = vld [vmem:[#allocation6] ss:$12 sps:$4 sm:$0xff]   ;;  %vm398_vm4 = vcmask 261120  }
  0x5c   : > { %v279_v10 = vrot.slane %v274_v8, %v269_v5  ;;  %254 = vrot.lane.b32.xlu0 %v742_v7, %s884_s9  ;;  %v1082_v11 = vrot.slane %v265_v9, %v269_v5  ;;  %s895_s11 = smov 126   ;;  %s896_s13 = smov 111   ;;  %v746_v54 = vld [vmem:[#allocation6 + $0x8] ss:$12 sps:$4 sm:$0xff]   ;;  %vm498_vm6 = vcmask 519168  }
  0x5d   : > { %s898_s14 = smov 120   ;;  %s899_s20 = smov 110  }
  0x5e   : > { %292 = vrot.lane.b32.xlu1 %v279_v10, %s885_s28 }
  0x60   : > { %281 = vrot.lane.b32.xlu0 %v279_v10, %s886_s29  ;;  %s608_s29 = sshll.u32 %s1067_s12, 3 }
  0x62   : > { %297 = vrot.lane.b32.xlu1 %v1082_v11, %s887_s10  ;;  %s625_s10 = sshll.u32 %s949_s19, 7  ;;  %s502_s19 = scalar_lea.sflag [#allocation5], %s1067_s12 }
  0x64   : > { %302 = vrot.lane.b32.xlu0 %v279_v10, %s888_s6  ;;  %s230_s6 = scalar_lea.vmem [#allocation8], %s608_s29 }
  0x66   : > { %287 = vrot.lane.b32.xlu1 %v1082_v11, %s889_s5  ;;  %s515_s5 = sshll.u32 %s230_s6, 4  ;;  %s1104_s5 = int_to_ptr.vmem [resolvable:$true] %s515_s5 }
  0xca   : > { %v253_v12 = vpop.permute.xlu0 %252 }
  0xcb   : > { %259 = vst.msk [vmem:[#allocation2] sm:$0xff] %vm258_vm2, %v253_v12 }
  0xce   : > { %v255_v13 = vpop.permute.xlu0 %254 }
  0xcf   : > { %260 = vst.msk [vmem:[#allocation2 + $0x8] sm:$0xff] %vm258_vm2, %v255_v13 }
  0xd0   : > { %v293_v15 = vpop.permute.xlu1 %292 }
  0xd2   : > { %v262_v14 = vld [vmem:[#allocation2] sm:$0xff]  ;;  %v282_v21 = vpop.permute.xlu0 %281 }
  0xd3   : > { %331 = vrot.lane.b32.xlu1 %v262_v14, %s890_s7  ;;  %v295_v16 = vmul.bf16 %v293_v15, %v262_v14  ;;  %v284_v22 = vmul.bf16 %v282_v21, %v262_v14  ;;  %v271_v36 = vmul.bf16 %v1082_v11, %v262_v14 }
  0xd4   : > { %v298_v19 = vpop.permute.xlu1 %297 }
  0xd5   : > { %v300_v20 = vmul.bf16 %v298_v19, %v262_v14 }
  0xd6   : > { %v263_v17 = vld [vmem:[#allocation2 + $0x8] sm:$0xff]  ;;  %v303_v29 = vpop.permute.xlu0 %302 }
  0xd7   : > { %333 = vrot.lane.b32.xlu0 %v263_v17, %s890_s7  ;;  %339 = vrot.lane.b32.xlu1 %v295_v16, %s891_s26  ;;  %v296_v18 = vmul.bf16 %v293_v15, %v263_v17  ;;  %v301_v24 = vmul.bf16 %v298_v19, %v263_v17  ;;  %v285_v26 = vmul.bf16 %v282_v21, %v263_v17 }
  0xd8   : > { %v288_v27 = vpop.permute.xlu1 %287  ;;  %v305_v31 = vmul.bf16 %v303_v29, %v262_v14  ;;  %v306_v32 = vmul.bf16 %v303_v29, %v263_v17  ;;  %v272_v38 = vmul.bf16 %v1082_v11, %v263_v17 }
  0xd9   : > { %v290_v28 = vmul.bf16 %v288_v27, %v262_v14  ;;  %v291_v30 = vmul.bf16 %v288_v27, %v263_v17 }
  0xdb   : > { %309 = vrot.lane.b32.xlu0 %v262_v14, %s892_s8  ;;  %341 = vrot.lane.b32.xlu1 %v296_v18, %s891_s26 }
  0xdf   : > { %311 = vrot.lane.b32.xlu0 %v263_v17, %s892_s8  ;;  %347 = vrot.lane.b32.xlu1 %v300_v20, %s893_s25  ;;  %s1102_s8 = scalar_lea.hbm %s1152_s4, %s625_s10 }
  0xe3   : > { %317 = vrot.lane.b32.xlu0 %v284_v22, %s895_s11  ;;  %349 = vrot.lane.b32.xlu1 %v301_v24, %s893_s25  ;;  %s805_s25 = scalar_lea.vmem %s1104_s5, 128 }
  0xe4   : > { %p806_p4 = scmp.ne.s32.totalorder %s1104_s5, %s805_s25 }
  0xe6   : > { %p807_p6 = pnand %p806_p4, %p1019_p12 }
  0xe7   : > { %319 = vrot.lane.b32.xlu0 %v285_v26, %s895_s11  ;;  %353 = vrot.lane.b32.xlu1 %v262_v14, %s896_s13  ;;  %s900_s11 = smov [#allocation8]  }
  0xe8   : > { %p808_p8 = pneg %p807_p6 }
  0xeb   : > { %325 = vrot.lane.b32.xlu0 %v290_v28, %s898_s14  ;;  %355 = vrot.lane.b32.xlu1 %v263_v17, %s896_s13  ;;  %s809_s13 = sshll.u32 %s900_s11, 4  ;;  %s810_s13 = int_to_ptr.vmem [resolvable:$false] %s809_s13 }
  0xec   : > { %p812_p10 = scmp.lt.s32.totalorder %s1104_s5, %s810_s13 }
  0xef   : > { %327 = vrot.lane.b32.xlu0 %v291_v30, %s898_s14  ;;  %361 = vrot.lane.b32.xlu1 %v305_v31, %s899_s20  ;;  %s811_s14 = scalar_lea.vmem %s810_s13, 256 }
  0xf0   : > { %p813_p13 = scmp.lt.s32.totalorder %s811_s14, %s805_s25 }
  0xf2   : > { %p814_p3 = por %p813_p13, %p812_p10 }
  0xf3   : > { %363 = vrot.lane.b32.xlu0 %v306_v32, %s899_s20  ;;  %375 = vperm.xlu1 %739, %v371_v33  }
  0xf4   : > { %p815_p7 = pnand %p814_p3, %p808_p8 }
  0xf7   : > { %380 = vperm.xlu0 %740, %v372_v34  }
 0x145   : > { %v332_v35 = vpop.permute.xlu1 %331 }
 0x146   : > { %626 = vmatprep.subr.bf16.mxu0 %v332_v35 }
 0x147   : > { %627 = vmatpush3.bf16.msra.mxu0 %v271_v36 }
 0x149   : > { %v334_v37 = vpop.permute.xlu0 %333  ;;  %v340_v39 = vpop.permute.xlu1 %339 }
 0x14a   : > { %628 = vmatprep.subr.bf16.mxu0 %v334_v37 }
 0x14b   : > { %629 = vmatpush3.bf16.msra.mxu0 %v272_v38 }
 0x14c   : > { %630 = vmatprep.subr.bf16.mxu0 %v340_v39 }
 0x14d   : > { %v310_v40 = vpop.permute.xlu0 %309  ;;  %v342_v41 = vpop.permute.xlu1 %341 }
 0x14f   : > { %631 = vmatpush3.bf16.msra.mxu0 %v310_v40 }
 0x150   : > { %632 = vmatprep.subr.bf16.mxu0 %v342_v41 }
 0x151   : > { %v312_v42 = vpop.permute.xlu0 %311  ;;  %v348_v43 = vpop.permute.xlu1 %347 }
 0x153   : > { %633 = vmatpush3.bf16.msra.mxu0 %v312_v42 }
 0x154   : > { %634 = vmatprep.subr.bf16.mxu0 %v348_v43 }
 0x155   : > { %v318_v44 = vpop.permute.xlu0 %317  ;;  %v350_v45 = vpop.permute.xlu1 %349 }
 0x157   : > { %635 = vmatpush3.bf16.msra.mxu0 %v318_v44 }
 0x158   : > { %636 = vmatprep.subr.bf16.mxu0 %v350_v45 }
 0x159   : > { %v320_v46 = vpop.permute.xlu0 %319  ;;  %v354_v47 = vpop.permute.xlu1 %353 }
 0x15b   : > { %637 = vmatpush3.bf16.msra.mxu0 %v320_v46 }
 0x15c   : > { %638 = vmatprep.subr.bf16.mxu0 %v354_v47 }
 0x15d   : > { %v326_v48 = vpop.permute.xlu0 %325  ;;  %v356_v49 = vpop.permute.xlu1 %355 }
 0x15f   : > { %639 = vmatpush3.bf16.msra.mxu0 %v326_v48 }
 0x160   : > { %640 = vmatprep.subr.bf16.mxu0 %v356_v49 }
 0x161   : > { %v328_v50 = vpop.permute.xlu0 %327  ;;  %v362_v51 = vpop.permute.xlu1 %361 }
 0x162   : > { %652 = vmatpush3.bf16.msra.mxu1 %v362_v51 }
 0x163   : > { %641 = vmatpush3.bf16.msra.mxu0 %v328_v50  ;;  %653 = vmatprep.subr.bf16.mxu1 %v894_v23 }
 0x165   : > { %v364_v53 = vpop.permute.xlu0 %363 }
 0x166   : > { %435 = vmatmul.mubr.bf16.vlgmr.msra.gmra.mrb[0].mxu0 %v743_v52  ;;  %654 = vmatpush3.bf16.msra.mxu1 %v364_v53 }
 0x169   : > { %656 = vmatmul.mubr.msk.bf16.vlgmr.msra.gmra.mrb[0].mxu1 %vm398_vm4, %v746_v54 }
 0x172   : > { %v376_v57 = vpop.permute.xlu1 %375 }
 0x176   : > { %v381_v61 = vpop.permute.xlu0 %380 }
 0x239   : > { %v642_v55 = vpop.f32.mrb[0].mxu0 }
 0x23a   : > { %v643_v56 = vpop.f32.mrb[1].mxu0 }
 0x23b   : > { %v644_v58 = vadd.f32 %v643_v56, %v642_v55  ;;  %v645_v59 = vpop.f32.mrb[2].mxu0 }
 0x23c   : > { %v646_v60 = vpop.f32.mrb[3].mxu0  ;;  %v477_v0 = vpop.f32.mrb[0].mxu1 }
 0x23d   : > { %v437_v62 = vadd.f32 %v644_v58, %v376_v57  ;;  %v647_v63 = vadd.f32 %v646_v60, %v645_v59  ;;  %v657_v1 = vpop.f32.mrb[1].mxu1 }
 0x23e   : > { %v480_v3 = vpop.f32.mrb[2].mxu1 }
 0x23f   : > { %v478_v2 = vadd.f32 %v477_v0, %v437_v62  ;;  %v440_v4 = vadd.f32 %v647_v63, %v381_v61  ;;  %v658_v5 = vpop.f32.mrb[3].mxu1 }
 0x241   : > { %vm484_vm5 = vcmp.ge.f32.partialorder %v478_v2, 0.0  ;;  %v486_v6 = vmul.f32 0.2, %v478_v2  ;;  %v481_v7 = vadd.f32 %v480_v3, %v440_v4 }
 0x243   : > { %v488_v8 = vsel %vm484_vm5, %v478_v2, %v486_v6  ;;  %vm485_vm7 = vcmp.ge.f32.partialorder %v481_v7, 0.0  ;;  %v487_v9 = vmul.f32 0.2, %v481_v7 }
 0x244   : > { %v623_v10 = vpack.c.bf16 %v488_v8, %v488_v8 }
 0x245   : > { %v489_v11 = vsel %vm485_vm7, %v481_v7, %v487_v9 }
 0x246   : > { %499 = vst.msk [vmem:[%s230_s6] sm:$0xf] %vm498_vm6, %v623_v10  ;;  %v624_v12 = vpack.c.bf16 %v489_v11, %v489_v11 }
 0x248   : > { %500 = vst.msk [vmem:[%s230_s6 + $0x4] sm:$0xf] %vm498_vm6, %v624_v12 }
 0x249   : > { %818 = shalt.err (!%p815_p7)
}
 0x24a   : > { %s819_s20 = scalar_lea.hbm %s1102_s8, 128  ;;  %s823_s9 = scalar_lea.hbm %s1152_s4, 256 }
 0x24b   : > { %p820_p9 = scmp.ne.s32.totalorder %s1102_s8, %s819_s20  ;;  %p824_p5 = scmp.lt.u32.totalorder %s1102_s8, %s1152_s4 }
 0x24c   : > { %p825_p1 = scmp.lt.u32.totalorder %s823_s9, %s819_s20  ;;  %p827_p4 = scmp.lt.u32.totalorder %s819_s20, %s1102_s8 }
 0x24d   : > { %p821_p2 = pnand %p820_p9, %p1019_p12 }
 0x24e   : > { %p826_p11 = por %p825_p1, %p824_p5 }
 0x24f   : > { %p822_p0 = pneg %p821_p2 }
 0x250   : > { %p828_p6 = por %p827_p4, %p826_p11 }
 0x252   : > { %p829_p8 = pnand %p828_p6, %p822_p0 }
 0x254   : > { %832 = shalt.err (!%p829_p8)
}
 0x255   : > { %s901_s10 = smov 64   ;;  %s902_s6 = smov 4  }
 0x256   : > { %665 = dma.vmem_to_hbm [thread:$0]  (%p1019_p12), %s1104_s5, 128, %s1102_s8, %s502_s19, %s901_s10, %s901_s10, %s902_s6  }
 0x257 PF: > { %s530_s7 = sand.u32 1, %s863_s15   ;;  %p1167_p10 = scmp.ne.s32.totalorder %s1157_s22, 0 }
 0x258   : > { %p1168_p13 = scmp.ge.s32.totalorder %s875_s18, 2  ;;  %s531_s26 = scalar_lea.sflag [#allocation5], %s530_s7 }
 0x25a   : > { %p676_p3 = pnand %p1168_p13, %p1167_p10 }
 0x25c   : > { %858 = dma.done.wait (!%p676_p3), %s531_s26, 128  }
 0x25d   : > { %860 = vsyncadd (!%p676_p3), %s531_s26, 4294967168  ;;  %p18_p7 = scmp.ge.s32.totalorder %s984_s27, 4   ;;  %s1169_s15 = smov %s867_s16 }
 0x25e   : > { %s1170_s16 = smov %s871_s17  ;;  %s1171_s17 = smov %s1015_s24 }
 0x25f   : > { %s1172_s18 = smov %s984_s27  ;;  %20 = sbr.rel (!%p18_p7) target bundleno = 6 (0x6), region = 85 }
 0x266   :  { %536 = vsyncpa [#allocation4], 1 }
 0x267   :  { %538 = vsyncpa [#allocation4 + $0x1], 1 }
 0x268   :  { %539 = vsyncpa [#allocation7], 1 }
 0x269   :  { %540 = vsyncpa [#allocation5], 1 }
 0x26a   :  { %542 = vsyncpa [#allocation5 + $0x1], 1 }

</bundles_post_ra>
